<compile_context>
chip_gen: v7x
topology: tpu7x:2x2x1
jax: 0.10.0
libtpu: 0.0.40
codegen_flags: <defaults>
</compile_context>

<pallas_src>
import numpy as np
import jax
import jax.numpy as jnp
from jax import lax
from jax.experimental import pallas as pl
from jax.experimental.pallas import tpu as pltpu  # noqa: F401  (kept for future tiling work)

# ---------- model dims (small, consistent with module signature) ----------
B = 2          # batch
S = 8          # sequence length
D_MODEL = 32
N_HEAD = 2
D_K = 16
D_V = 16
D_INNER = 64
TEMP = float(D_K) ** 0.5
EPS = 1e-6
HEAD_W = 2 * D_K + D_V      # width of one head's [q|k|v] block in the fused projection (48)


def encoder_layer_kernel(x_ref, wqkv_ref, wo_ref,
                         w1_ref, b1_ref, w2_ref, b2_ref,
                         g1_ref, be1_ref, g2_ref, be2_ref,
                         out_ref, attn_ref):
    """Single invocation: x_ref is the flattened (B*S, D_MODEL) token matrix."""
    x = x_ref[...]                                                     # (B*S, D_MODEL)

    # ---- fused head-major Q/K/V projection: one MXU matmul, 96-lane output ----
    # Q columns are pre-scaled by 1/sqrt(d_k) in the wrapper's weight prep.
    qkv = jnp.dot(x, wqkv_ref[...], preferred_element_type=jnp.float32)  # (B*S, H*(2Dk+Dv))

    o_blocks = []        # per-batch accumulators (residual + attention output projection)
    attn_blocks = []     # per-(batch, head) attention matrices, concatenated lane-wise at the end
    for b in range(B):
        row_lo, row_hi = b * S, (b + 1) * S
        ob = x[row_lo:row_hi, :]                  # init with residual — absorbs `+ x`
        for h in range(N_HEAD):
            # One contiguous 48-lane slice per head; q/k/v are adjacent sub-slices of it.
            blk = qkv[row_lo:row_hi, h * HEAD_W:(h + 1) * HEAD_W]       # (S, 48)
            qh = blk[:, :D_K]                                           # already / sqrt(d_k)
            kh = blk[:, D_K:2 * D_K]
            vh = blk[:, 2 * D_K:2 * D_K + D_V]

            # scores = qh @ kh.T without materializing a transpose.
            scores = lax.dot_general(qh, kh, (((1,), (1,)), ((), ())),
                                     preferred_element_type=jnp.float32)   # (S, S)
            scores = scores - jnp.max(scores, axis=-1, keepdims=True)
            e = jnp.exp(scores)
            attn = e * pl.reciprocal(jnp.sum(e, axis=-1, keepdims=True))   # softmax (exact)
            attn_blocks.append(attn)

            # Project this head's context through its slice of wo and accumulate —
            # no ctx scratch slab, no per-head VMEM stores.
            ctx = jnp.dot(attn, vh, preferred_element_type=jnp.float32)    # (S, D_V)
            ob = ob + jnp.dot(ctx, wo_ref[h * D_V:(h + 1) * D_V, :],
                              preferred_element_type=jnp.float32)          # (S, D_MODEL)
        o_blocks.append(ob)

    # Single lane-dense store of the attention weights: (S, B*H*S) = (8, 32).
    attn_ref[...] = jnp.concatenate(attn_blocks, axis=1)

    # ---- LayerNorm 1 over all B*S rows at once ----
    o = jnp.concatenate(o_blocks, axis=0)                                  # (B*S, D_MODEL)
    mean1 = jnp.mean(o, axis=-1, keepdims=True)
    var1 = jnp.mean((o - mean1) ** 2, axis=-1, keepdims=True)
    o = (o - mean1) * lax.rsqrt(var1 + EPS) * g1_ref[...] + be1_ref[...]

    # ---- position-wise feed-forward + residual + LayerNorm 2 ----
    residual2 = o
    h1 = jnp.dot(o, w1_ref[...], preferred_element_type=jnp.float32) + b1_ref[...]
    h1 = jnp.maximum(h1, 0.0)                                              # ReLU
    h2 = jnp.dot(h1, w2_ref[...], preferred_element_type=jnp.float32) + b2_ref[...]
    y = h2 + residual2
    mean2 = jnp.mean(y, axis=-1, keepdims=True)
    var2 = jnp.mean((y - mean2) ** 2, axis=-1, keepdims=True)
    y = (y - mean2) * lax.rsqrt(var2 + EPS) * g2_ref[...] + be2_ref[...]

    out_ref[...] = y


def prepare_params(params):
    """One-time weight prep: head-major fused QKV weight with 1/sqrt(d_k) folded into Q."""
    (wq, wk, wv, wo, w1, b1, w2, b2, g1, be1, g2, be2) = params
    wq_scaled = wq * (1.0 / TEMP)                     # power-of-two scale at these dims: exact
    head_blocks = []
    for h in range(N_HEAD):
        head_blocks += [wq_scaled[:, h * D_K:(h + 1) * D_K],
                        wk[:, h * D_K:(h + 1) * D_K],
                        wv[:, h * D_V:(h + 1) * D_V]]
    wqkv = jnp.concatenate(head_blocks, axis=1)       # (D_MODEL, N_HEAD*(2*D_K+D_V)) head-major
    return (wqkv, wo, w1, b1, w2, b2, g1, be1, g2, be2)


@jax.jit
def encoder_layer(x, prep):
    """x: (B, S, D_MODEL) f32 -> (enc_output (B,S,D_MODEL), attn (B,N_HEAD,S,S))."""
    (wqkv, wo, w1, b1, w2, b2, g1, be1, g2, be2) = prep
    x_flat = x.reshape(B * S, D_MODEL)

    out_flat, attn_flat = pl.pallas_call(
        encoder_layer_kernel,
        out_shape=(
            jax.ShapeDtypeStruct((B * S, D_MODEL), jnp.float32),          # enc_output (flat)
            jax.ShapeDtypeStruct((S, B * N_HEAD * S), jnp.float32),       # attn, lane-dense slab
        ),
    )(x_flat, wqkv, wo, w1, b1, w2, b2, g1, be1, g2, be2)

    out = out_flat.reshape(B, S, D_MODEL)
    # slab[q, (b*H + h)*S + k] -> attn[b, h, q, k]
    attn = attn_flat.reshape(S, B, N_HEAD, S).transpose(1, 2, 0, 3)
    return out, attn


# ---------------- pure-JAX reference (for correctness check) ----------------
def encoder_layer_ref(x, params):
    (wq, wk, wv, wo, w1, b1, w2, b2, g1, be1, g2, be2) = params
    residual = x
    q = (x @ wq).reshape(B, S, N_HEAD, D_K).transpose(0, 2, 1, 3)
    k = (x @ wk).reshape(B, S, N_HEAD, D_K).transpose(0, 2, 1, 3)
    v = (x @ wv).reshape(B, S, N_HEAD, D_V).transpose(0, 2, 1, 3)
    scores = jnp.einsum("bhqd,bhkd->bhqk", q / TEMP, k)
    attn = jax.nn.softmax(scores, axis=-1)
    o = jnp.einsum("bhqk,bhkd->bhqd", attn, v)
    o = o.transpose(0, 2, 1, 3).reshape(B, S, N_HEAD * D_V) @ wo
    o = o + residual
    mu = o.mean(-1, keepdims=True)
    var = ((o - mu) ** 2).mean(-1, keepdims=True)
    o = (o - mu) / jnp.sqrt(var + EPS) * g1[0] + be1[0]
    r2 = o
    h = jnp.maximum(o @ w1 + b1[0], 0.0)
    y = h @ w2 + b2[0] + r2
    mu2 = y.mean(-1, keepdims=True)
    var2 = ((y - mu2) ** 2).mean(-1, keepdims=True)
    y = (y - mu2) / jnp.sqrt(var2 + EPS) * g2[0] + be2[0]
    return y, attn


def init_params(key):
    ks = jax.random.split(key, 8)
    scale = 0.05
    wq = scale * jax.random.normal(ks[0], (D_MODEL, N_HEAD * D_K), jnp.float32)
    wk = scale * jax.random.normal(ks[1], (D_MODEL, N_HEAD * D_K), jnp.float32)
    wv = scale * jax.random.normal(ks[2], (D_MODEL, N_HEAD * D_V), jnp.float32)
    wo = scale * jax.random.normal(ks[3], (N_HEAD * D_V, D_MODEL), jnp.float32)
    w1 = scale * jax.random.normal(ks[4], (D_MODEL, D_INNER), jnp.float32)
    b1 = scale * jax.random.normal(ks[5], (1, D_INNER), jnp.float32)
    w2 = scale * jax.random.normal(ks[6], (D_INNER, D_MODEL), jnp.float32)
    b2 = scale * jax.random.normal(ks[7], (1, D_MODEL), jnp.float32)
    g1 = jnp.ones((1, D_MODEL), jnp.float32)    # LayerNorm default init
    be1 = jnp.zeros((1, D_MODEL), jnp.float32)
    g2 = jnp.ones((1, D_MODEL), jnp.float32)
    be2 = jnp.zeros((1, D_MODEL), jnp.float32)
    return (wq, wk, wv, wo, w1, b1, w2, b2, g1, be1, g2, be2)


if __name__ == "__main__":
    key = jax.random.PRNGKey(0)
    k_x, k_p = jax.random.split(key)
    x = jax.random.normal(k_x, (B, S, D_MODEL), jnp.float32)
    params = init_params(k_p)

    prep = jax.block_until_ready(prepare_params(params))   # one-time weight prep
    out, attn = jax.block_until_ready(encoder_layer(x, prep))
    ref_out, ref_attn = encoder_layer_ref(x, params)

    np.testing.assert_allclose(np.asarray(out), np.asarray(ref_out), rtol=1e-4, atol=1e-4)
    np.testing.assert_allclose(np.asarray(attn), np.asarray(ref_attn), rtol=1e-4, atol=1e-4)

    print("KERNEL_OK")
</pallas_src>

<mosaic_0001>
module attributes {stable_mosaic.version = 11 : i64} {
  func.func @encoder_layer_kernel(%arg0: memref<16x32xf32, #tpu.memory_space<vmem>>, %arg1: memref<32x96xf32, #tpu.memory_space<vmem>>, %arg2: memref<32x32xf32, #tpu.memory_space<vmem>>, %arg3: memref<32x64xf32, #tpu.memory_space<vmem>>, %arg4: memref<1x64xf32, #tpu.memory_space<vmem>>, %arg5: memref<64x32xf32, #tpu.memory_space<vmem>>, %arg6: memref<1x32xf32, #tpu.memory_space<vmem>>, %arg7: memref<1x32xf32, #tpu.memory_space<vmem>>, %arg8: memref<1x32xf32, #tpu.memory_space<vmem>>, %arg9: memref<1x32xf32, #tpu.memory_space<vmem>>, %arg10: memref<1x32xf32, #tpu.memory_space<vmem>>, %arg11: memref<16x32xf32, #tpu.memory_space<vmem>>, %arg12: memref<8x32xf32, #tpu.memory_space<vmem>>) attributes {dimension_semantics = [], scalar_prefetch = 0 : i64, scratch_operands = 0 : i64, tpu.core_type = #tpu.core_type<tc>} {
    %c0 = arith.constant 0 : index
    %c0_0 = arith.constant 0 : index
    %0 = vector.load %arg0[%c0, %c0_0] : memref<16x32xf32, #tpu.memory_space<vmem>>, vector<16x32xf32>
    %c0_1 = arith.constant 0 : index
    %c0_2 = arith.constant 0 : index
    %1 = vector.load %arg1[%c0_1, %c0_2] : memref<32x96xf32, #tpu.memory_space<vmem>>, vector<32x96xf32>
    %cst = arith.constant dense<0.000000e+00> : vector<16x96xf32>
    %2 = tpu.matmul %0, %1, %cst {dimension_numbers = #tpu.dot_dimension_numbers<[1], [0], [0], [1], [0, 0, 1, 1], [], []>} : vector<16x32xf32>, vector<32x96xf32>, vector<16x96xf32> -> vector<16x96xf32>
    %3 = vector.extract_strided_slice %0 {offsets = [0, 0], sizes = [8, 32], strides = [1, 1]} : vector<16x32xf32> to vector<8x32xf32>
    %4 = vector.extract_strided_slice %2 {offsets = [0, 0], sizes = [8, 48], strides = [1, 1]} : vector<16x96xf32> to vector<8x48xf32>
    %5 = vector.extract_strided_slice %4 {offsets = [0, 0], sizes = [8, 16], strides = [1, 1]} : vector<8x48xf32> to vector<8x16xf32>
    %6 = vector.extract_strided_slice %4 {offsets = [0, 16], sizes = [8, 16], strides = [1, 1]} : vector<8x48xf32> to vector<8x16xf32>
    %7 = vector.extract_strided_slice %4 {offsets = [0, 32], sizes = [8, 16], strides = [1, 1]} : vector<8x48xf32> to vector<8x16xf32>
    %cst_3 = arith.constant dense<0.000000e+00> : vector<8x8xf32>
    %8 = tpu.matmul %5, %6, %cst_3 {dimension_numbers = #tpu.dot_dimension_numbers<[1], [1], [0], [0], [0, 0, 1, 0], [], []>} : vector<8x16xf32>, vector<8x16xf32>, vector<8x8xf32> -> vector<8x8xf32>
    %cst_4 = arith.constant dense<0xFF800000> : vector<8xf32>
    %9 = vector.multi_reduction <maximumf>, %8, %cst_4 [1] : vector<8x8xf32> to vector<8xf32>
    %10 = vector.shape_cast %9 : vector<8xf32> to vector<8x1xf32>
    %11 = vector.broadcast %10 : vector<8x1xf32> to vector<8x8xf32>
    %12 = arith.subf %8, %11 : vector<8x8xf32>
    %13 = math.exp %12 : vector<8x8xf32>
    %cst_5 = arith.constant dense<0.000000e+00> : vector<8xf32>
    %14 = vector.multi_reduction <add>, %13, %cst_5 [1] : vector<8x8xf32> to vector<8xf32>
    %15 = vector.shape_cast %14 : vector<8xf32> to vector<8x1xf32>
    %16 = tpu.reciprocal %15 : vector<8x1xf32> -> vector<8x1xf32>
    %17 = vector.broadcast %16 : vector<8x1xf32> to vector<8x8xf32>
    %18 = arith.mulf %13, %17 : vector<8x8xf32>
    %cst_6 = arith.constant dense<0.000000e+00> : vector<8x16xf32>
    %19 = tpu.matmul %18, %7, %cst_6 {dimension_numbers = #tpu.dot_dimension_numbers<[1], [0], [0], [1], [0, 0, 1, 1], [], []>} : vector<8x8xf32>, vector<8x16xf32>, vector<8x16xf32> -> vector<8x16xf32>
    %c0_7 = arith.constant 0 : index
    %c0_8 = arith.constant 0 : index
    %20 = vector.load %arg2[%c0_7, %c0_8] : memref<32x32xf32, #tpu.memory_space<vmem>>, vector<16x32xf32>
    %cst_9 = arith.constant dense<0.000000e+00> : vector<8x32xf32>
    %21 = tpu.matmul %19, %20, %cst_9 {dimension_numbers = #tpu.dot_dimension_numbers<[1], [0], [0], [1], [0, 0, 1, 1], [], []>} : vector<8x16xf32>, vector<16x32xf32>, vector<8x32xf32> -> vector<8x32xf32>
    %22 = arith.addf %3, %21 : vector<8x32xf32>
    %23 = vector.extract_strided_slice %2 {offsets = [0, 48], sizes = [8, 48], strides = [1, 1]} : vector<16x96xf32> to vector<8x48xf32>
    %24 = vector.extract_strided_slice %23 {offsets = [0, 0], sizes = [8, 16], strides = [1, 1]} : vector<8x48xf32> to vector<8x16xf32>
    %25 = vector.extract_strided_slice %23 {offsets = [0, 16], sizes = [8, 16], strides = [1, 1]} : vector<8x48xf32> to vector<8x16xf32>
    %26 = vector.extract_strided_slice %23 {offsets = [0, 32], sizes = [8, 16], strides = [1, 1]} : vector<8x48xf32> to vector<8x16xf32>
    %cst_10 = arith.constant dense<0.000000e+00> : vector<8x8xf32>
    %27 = tpu.matmul %24, %25, %cst_10 {dimension_numbers = #tpu.dot_dimension_numbers<[1], [1], [0], [0], [0, 0, 1, 0], [], []>} : vector<8x16xf32>, vector<8x16xf32>, vector<8x8xf32> -> vector<8x8xf32>
    %cst_11 = arith.constant dense<0xFF800000> : vector<8xf32>
    %28 = vector.multi_reduction <maximumf>, %27, %cst_11 [1] : vector<8x8xf32> to vector<8xf32>
    %29 = vector.shape_cast %28 : vector<8xf32> to vector<8x1xf32>
    %30 = vector.broadcast %29 : vector<8x1xf32> to vector<8x8xf32>
    %31 = arith.subf %27, %30 : vector<8x8xf32>
    %32 = math.exp %31 : vector<8x8xf32>
    %cst_12 = arith.constant dense<0.000000e+00> : vector<8xf32>
    %33 = vector.multi_reduction <add>, %32, %cst_12 [1] : vector<8x8xf32> to vector<8xf32>
    %34 = vector.shape_cast %33 : vector<8xf32> to vector<8x1xf32>
    %35 = tpu.reciprocal %34 : vector<8x1xf32> -> vector<8x1xf32>
    %36 = vector.broadcast %35 : vector<8x1xf32> to vector<8x8xf32>
    %37 = arith.mulf %32, %36 : vector<8x8xf32>
    %cst_13 = arith.constant dense<0.000000e+00> : vector<8x16xf32>
    %38 = tpu.matmul %37, %26, %cst_13 {dimension_numbers = #tpu.dot_dimension_numbers<[1], [0], [0], [1], [0, 0, 1, 1], [], []>} : vector<8x8xf32>, vector<8x16xf32>, vector<8x16xf32> -> vector<8x16xf32>
    %c16 = arith.constant 16 : index
    %c0_14 = arith.constant 0 : index
    %39 = vector.load %arg2[%c16, %c0_14] : memref<32x32xf32, #tpu.memory_space<vmem>>, vector<16x32xf32>
    %cst_15 = arith.constant dense<0.000000e+00> : vector<8x32xf32>
    %40 = tpu.matmul %38, %39, %cst_15 {dimension_numbers = #tpu.dot_dimension_numbers<[1], [0], [0], [1], [0, 0, 1, 1], [], []>} : vector<8x16xf32>, vector<16x32xf32>, vector<8x32xf32> -> vector<8x32xf32>
    %41 = arith.addf %22, %40 : vector<8x32xf32>
    %42 = vector.extract_strided_slice %0 {offsets = [8, 0], sizes = [8, 32], strides = [1, 1]} : vector<16x32xf32> to vector<8x32xf32>
    %43 = vector.extract_strided_slice %2 {offsets = [8, 0], sizes = [8, 48], strides = [1, 1]} : vector<16x96xf32> to vector<8x48xf32>
    %44 = vector.extract_strided_slice %43 {offsets = [0, 0], sizes = [8, 16], strides = [1, 1]} : vector<8x48xf32> to vector<8x16xf32>
    %45 = vector.extract_strided_slice %43 {offsets = [0, 16], sizes = [8, 16], strides = [1, 1]} : vector<8x48xf32> to vector<8x16xf32>
    %46 = vector.extract_strided_slice %43 {offsets = [0, 32], sizes = [8, 16], strides = [1, 1]} : vector<8x48xf32> to vector<8x16xf32>
    %cst_16 = arith.constant dense<0.000000e+00> : vector<8x8xf32>
    %47 = tpu.matmul %44, %45, %cst_16 {dimension_numbers = #tpu.dot_dimension_numbers<[1], [1], [0], [0], [0, 0, 1, 0], [], []>} : vector<8x16xf32>, vector<8x16xf32>, vector<8x8xf32> -> vector<8x8xf32>
    %cst_17 = arith.constant dense<0xFF800000> : vector<8xf32>
    %48 = vector.multi_reduction <maximumf>, %47, %cst_17 [1] : vector<8x8xf32> to vector<8xf32>
    %49 = vector.shape_cast %48 : vector<8xf32> to vector<8x1xf32>
    %50 = vector.broadcast %49 : vector<8x1xf32> to vector<8x8xf32>
    %51 = arith.subf %47, %50 : vector<8x8xf32>
    %52 = math.exp %51 : vector<8x8xf32>
    %cst_18 = arith.constant dense<0.000000e+00> : vector<8xf32>
    %53 = vector.multi_reduction <add>, %52, %cst_18 [1] : vector<8x8xf32> to vector<8xf32>
    %54 = vector.shape_cast %53 : vector<8xf32> to vector<8x1xf32>
    %55 = tpu.reciprocal %54 : vector<8x1xf32> -> vector<8x1xf32>
    %56 = vector.broadcast %55 : vector<8x1xf32> to vector<8x8xf32>
    %57 = arith.mulf %52, %56 : vector<8x8xf32>
    %cst_19 = arith.constant dense<0.000000e+00> : vector<8x16xf32>
    %58 = tpu.matmul %57, %46, %cst_19 {dimension_numbers = #tpu.dot_dimension_numbers<[1], [0], [0], [1], [0, 0, 1, 1], [], []>} : vector<8x8xf32>, vector<8x16xf32>, vector<8x16xf32> -> vector<8x16xf32>
    %c0_20 = arith.constant 0 : index
    %c0_21 = arith.constant 0 : index
    %59 = vector.load %arg2[%c0_20, %c0_21] : memref<32x32xf32, #tpu.memory_space<vmem>>, vector<16x32xf32>
    %cst_22 = arith.constant dense<0.000000e+00> : vector<8x32xf32>
    %60 = tpu.matmul %58, %59, %cst_22 {dimension_numbers = #tpu.dot_dimension_numbers<[1], [0], [0], [1], [0, 0, 1, 1], [], []>} : vector<8x16xf32>, vector<16x32xf32>, vector<8x32xf32> -> vector<8x32xf32>
    %61 = arith.addf %42, %60 : vector<8x32xf32>
    %62 = vector.extract_strided_slice %2 {offsets = [8, 48], sizes = [8, 48], strides = [1, 1]} : vector<16x96xf32> to vector<8x48xf32>
    %63 = vector.extract_strided_slice %62 {offsets = [0, 0], sizes = [8, 16], strides = [1, 1]} : vector<8x48xf32> to vector<8x16xf32>
    %64 = vector.extract_strided_slice %62 {offsets = [0, 16], sizes = [8, 16], strides = [1, 1]} : vector<8x48xf32> to vector<8x16xf32>
    %65 = vector.extract_strided_slice %62 {offsets = [0, 32], sizes = [8, 16], strides = [1, 1]} : vector<8x48xf32> to vector<8x16xf32>
    %cst_23 = arith.constant dense<0.000000e+00> : vector<8x8xf32>
    %66 = tpu.matmul %63, %64, %cst_23 {dimension_numbers = #tpu.dot_dimension_numbers<[1], [1], [0], [0], [0, 0, 1, 0], [], []>} : vector<8x16xf32>, vector<8x16xf32>, vector<8x8xf32> -> vector<8x8xf32>
    %cst_24 = arith.constant dense<0xFF800000> : vector<8xf32>
    %67 = vector.multi_reduction <maximumf>, %66, %cst_24 [1] : vector<8x8xf32> to vector<8xf32>
    %68 = vector.shape_cast %67 : vector<8xf32> to vector<8x1xf32>
    %69 = vector.broadcast %68 : vector<8x1xf32> to vector<8x8xf32>
    %70 = arith.subf %66, %69 : vector<8x8xf32>
    %71 = math.exp %70 : vector<8x8xf32>
    %cst_25 = arith.constant dense<0.000000e+00> : vector<8xf32>
    %72 = vector.multi_reduction <add>, %71, %cst_25 [1] : vector<8x8xf32> to vector<8xf32>
    %73 = vector.shape_cast %72 : vector<8xf32> to vector<8x1xf32>
    %74 = tpu.reciprocal %73 : vector<8x1xf32> -> vector<8x1xf32>
    %75 = vector.broadcast %74 : vector<8x1xf32> to vector<8x8xf32>
    %76 = arith.mulf %71, %75 : vector<8x8xf32>
    %cst_26 = arith.constant dense<0.000000e+00> : vector<8x16xf32>
    %77 = tpu.matmul %76, %65, %cst_26 {dimension_numbers = #tpu.dot_dimension_numbers<[1], [0], [0], [1], [0, 0, 1, 1], [], []>} : vector<8x8xf32>, vector<8x16xf32>, vector<8x16xf32> -> vector<8x16xf32>
    %c16_27 = arith.constant 16 : index
    %c0_28 = arith.constant 0 : index
    %78 = vector.load %arg2[%c16_27, %c0_28] : memref<32x32xf32, #tpu.memory_space<vmem>>, vector<16x32xf32>
    %cst_29 = arith.constant dense<0.000000e+00> : vector<8x32xf32>
    %79 = tpu.matmul %77, %78, %cst_29 {dimension_numbers = #tpu.dot_dimension_numbers<[1], [0], [0], [1], [0, 0, 1, 1], [], []>} : vector<8x16xf32>, vector<16x32xf32>, vector<8x32xf32> -> vector<8x32xf32>
    %80 = arith.addf %61, %79 : vector<8x32xf32>
    %81 = tpu.concatenate %18, %37, %57, %76 in 1 : vector<8x8xf32>, vector<8x8xf32>, vector<8x8xf32>, vector<8x8xf32> -> vector<8x32xf32>
    %c0_30 = arith.constant 0 : index
    %c0_31 = arith.constant 0 : index
    %82 = vector.load %arg12[%c0_30, %c0_31] : memref<8x32xf32, #tpu.memory_space<vmem>>, vector<8x32xf32>
    tpu.vector_store %arg12[%c0_30, %c0_31], %81 {strides = array<i32>} : memref<8x32xf32, #tpu.memory_space<vmem>>, vector<8x32xf32>,
    %83 = tpu.concatenate %41, %80 in 0 : vector<8x32xf32>, vector<8x32xf32> -> vector<16x32xf32>
    %cst_32 = arith.constant dense<0.000000e+00> : vector<16xf32>
    %84 = vector.multi_reduction <add>, %83, %cst_32 [1] : vector<16x32xf32> to vector<16xf32>
    %85 = vector.shape_cast %84 : vector<16xf32> to vector<16x1xf32>
    %cst_33 = arith.constant 3.200000e+01 : f32
    %86 = vector.broadcast %cst_33 : f32 to vector<16x1xf32>
    %87 = arith.divf %85, %86 : vector<16x1xf32>
    %88 = vector.broadcast %87 : vector<16x1xf32> to vector<16x32xf32>
    %89 = arith.subf %83, %88 : vector<16x32xf32>
    %90 = arith.mulf %89, %89 : vector<16x32xf32>
    %cst_34 = arith.constant dense<0.000000e+00> : vector<16xf32>
    %91 = vector.multi_reduction <add>, %90, %cst_34 [1] : vector<16x32xf32> to vector<16xf32>
    %92 = vector.shape_cast %91 : vector<16xf32> to vector<16x1xf32>
    %cst_35 = arith.constant 3.200000e+01 : f32
    %93 = vector.broadcast %cst_35 : f32 to vector<16x1xf32>
    %94 = arith.divf %92, %93 : vector<16x1xf32>
    %95 = vector.broadcast %87 : vector<16x1xf32> to vector<16x32xf32>
    %96 = arith.subf %83, %95 : vector<16x32xf32>
    %cst_36 = arith.constant 9.99999997E-7 : f32
    %97 = vector.broadcast %cst_36 : f32 to vector<16x1xf32>
    %98 = arith.addf %94, %97 : vector<16x1xf32>
    %99 = math.rsqrt %98 : vector<16x1xf32>
    %100 = vector.broadcast %99 : vector<16x1xf32> to vector<16x32xf32>
    %101 = arith.mulf %96, %100 : vector<16x32xf32>
    %c0_37 = arith.constant 0 : index
    %c0_38 = arith.constant 0 : index
    %102 = vector.load %arg7[%c0_37, %c0_38] : memref<1x32xf32, #tpu.memory_space<vmem>>, vector<1x32xf32>
    %103 = vector.broadcast %102 : vector<1x32xf32> to vector<16x32xf32>
    %104 = arith.mulf %101, %103 : vector<16x32xf32>
    %c0_39 = arith.constant 0 : index
    %c0_40 = arith.constant 0 : index
    %105 = vector.load %arg8[%c0_39, %c0_40] : memref<1x32xf32, #tpu.memory_space<vmem>>, vector<1x32xf32>
    %106 = vector.broadcast %105 : vector<1x32xf32> to vector<16x32xf32>
    %107 = arith.addf %104, %106 : vector<16x32xf32>
    %c0_41 = arith.constant 0 : index
    %c0_42 = arith.constant 0 : index
    %108 = vector.load %arg3[%c0_41, %c0_42] : memref<32x64xf32, #tpu.memory_space<vmem>>, vector<32x64xf32>
    %cst_43 = arith.constant dense<0.000000e+00> : vector<16x64xf32>
    %109 = tpu.matmul %107, %108, %cst_43 {dimension_numbers = #tpu.dot_dimension_numbers<[1], [0], [0], [1], [0, 0, 1, 1], [], []>} : vector<16x32xf32>, vector<32x64xf32>, vector<16x64xf32> -> vector<16x64xf32>
    %c0_44 = arith.constant 0 : index
    %c0_45 = arith.constant 0 : index
    %110 = vector.load %arg4[%c0_44, %c0_45] : memref<1x64xf32, #tpu.memory_space<vmem>>, vector<1x64xf32>
    %111 = vector.broadcast %110 : vector<1x64xf32> to vector<16x64xf32>
    %112 = arith.addf %109, %111 : vector<16x64xf32>
    %cst_46 = arith.constant 0.000000e+00 : f32
    %113 = vector.broadcast %cst_46 : f32 to vector<16x64xf32>
    %114 = arith.maximumf %112, %113 : vector<16x64xf32>
    %c0_47 = arith.constant 0 : index
    %c0_48 = arith.constant 0 : index
    %115 = vector.load %arg5[%c0_47, %c0_48] : memref<64x32xf32, #tpu.memory_space<vmem>>, vector<64x32xf32>
    %cst_49 = arith.constant dense<0.000000e+00> : vector<16x32xf32>
    %116 = tpu.matmul %114, %115, %cst_49 {dimension_numbers = #tpu.dot_dimension_numbers<[1], [0], [0], [1], [0, 0, 1, 1], [], []>} : vector<16x64xf32>, vector<64x32xf32>, vector<16x32xf32> -> vector<16x32xf32>
    %c0_50 = arith.constant 0 : index
    %c0_51 = arith.constant 0 : index
    %117 = vector.load %arg6[%c0_50, %c0_51] : memref<1x32xf32, #tpu.memory_space<vmem>>, vector<1x32xf32>
    %118 = vector.broadcast %117 : vector<1x32xf32> to vector<16x32xf32>
    %119 = arith.addf %116, %118 : vector<16x32xf32>
    %120 = arith.addf %119, %107 : vector<16x32xf32>
    %cst_52 = arith.constant dense<0.000000e+00> : vector<16xf32>
    %121 = vector.multi_reduction <add>, %120, %cst_52 [1] : vector<16x32xf32> to vector<16xf32>
    %122 = vector.shape_cast %121 : vector<16xf32> to vector<16x1xf32>
    %cst_53 = arith.constant 3.200000e+01 : f32
    %123 = vector.broadcast %cst_53 : f32 to vector<16x1xf32>
    %124 = arith.divf %122, %123 : vector<16x1xf32>
    %125 = vector.broadcast %124 : vector<16x1xf32> to vector<16x32xf32>
    %126 = arith.subf %120, %125 : vector<16x32xf32>
    %127 = arith.mulf %126, %126 : vector<16x32xf32>
    %cst_54 = arith.constant dense<0.000000e+00> : vector<16xf32>
    %128 = vector.multi_reduction <add>, %127, %cst_54 [1] : vector<16x32xf32> to vector<16xf32>
    %129 = vector.shape_cast %128 : vector<16xf32> to vector<16x1xf32>
    %cst_55 = arith.constant 3.200000e+01 : f32
    %130 = vector.broadcast %cst_55 : f32 to vector<16x1xf32>
    %131 = arith.divf %129, %130 : vector<16x1xf32>
    %132 = vector.broadcast %124 : vector<16x1xf32> to vector<16x32xf32>
    %133 = arith.subf %120, %132 : vector<16x32xf32>
    %cst_56 = arith.constant 9.99999997E-7 : f32
    %134 = vector.broadcast %cst_56 : f32 to vector<16x1xf32>
    %135 = arith.addf %131, %134 : vector<16x1xf32>
    %136 = math.rsqrt %135 : vector<16x1xf32>
    %137 = vector.broadcast %136 : vector<16x1xf32> to vector<16x32xf32>
    %138 = arith.mulf %133, %137 : vector<16x32xf32>
    %c0_57 = arith.constant 0 : index
    %c0_58 = arith.constant 0 : index
    %139 = vector.load %arg9[%c0_57, %c0_58] : memref<1x32xf32, #tpu.memory_space<vmem>>, vector<1x32xf32>
    %140 = vector.broadcast %139 : vector<1x32xf32> to vector<16x32xf32>
    %141 = arith.mulf %138, %140 : vector<16x32xf32>
    %c0_59 = arith.constant 0 : index
    %c0_60 = arith.constant 0 : index
    %142 = vector.load %arg10[%c0_59, %c0_60] : memref<1x32xf32, #tpu.memory_space<vmem>>, vector<1x32xf32>
    %143 = vector.broadcast %142 : vector<1x32xf32> to vector<16x32xf32>
    %144 = arith.addf %141, %143 : vector<16x32xf32>
    %c0_61 = arith.constant 0 : index
    %c0_62 = arith.constant 0 : index
    %145 = vector.load %arg11[%c0_61, %c0_62] : memref<16x32xf32, #tpu.memory_space<vmem>>, vector<16x32xf32>
    tpu.vector_store %arg11[%c0_61, %c0_62], %144 {strides = array<i32>} : memref<16x32xf32, #tpu.memory_space<vmem>>, vector<16x32xf32>,
    return
  }
}

</mosaic_0001>

<bundles_post_ra>
// kernel: encoder_layer.1
= control target key start
LH: loop header
LB: loop body
LE: loop exit
PB: predicated region body
PF: predicated region fallthrough
CT: control target
= control target key end

     0   :  { %18 = vsyncpa [#allocation3], 0  ;;  %s2059_s0 = inlined_call_operand.hbm [shape: f32[16,32], index: 0, kind: input, shape index: {}]   ;;  %s2060_s1 = inlined_call_operand.vmem [shape: f32[32,96], index: 1, kind: input, shape index: {}]   ;;  %s2061_s2 = inlined_call_operand.vmem [shape: f32[32,32], index: 2, kind: input, shape index: {}]   ;;  %s2062_s3 = inlined_call_operand.vmem [shape: f32[32,64], index: 3, kind: input, shape index: {}]   ;;  %s2063_s4 = inlined_call_operand.vmem [shape: f32[1,64], index: 4, kind: input, shape index: {}]   ;;  %s2064_s5 = inlined_call_operand.vmem [shape: f32[64,32], index: 5, kind: input, shape index: {}]   ;;  %s2065_s6 = inlined_call_operand.vmem [shape: f32[1,32], index: 6, kind: input, shape index: {}]   ;;  %s2066_s7 = inlined_call_operand.vmem [shape: f32[1,32], index: 7, kind: input, shape index: {}]   ;;  %s2067_s8 = inlined_call_operand.vmem [shape: f32[1,32], index: 8, kind: input, shape index: {}]   ;;  %s2068_s9 = inlined_call_operand.vmem [shape: f32[1,32], index: 9, kind: input, shape index: {}]   ;;  %s2069_s10 = inlined_call_operand.vmem [shape: f32[1,32], index: 10, kind: input, shape index: {}]   ;;  %s2070_s11 = inlined_call_operand.hbm [shape: f32[16,32], index: 11, kind: output, shape index: {0}]   ;;  %s2071_s12 = inlined_call_operand.vmem [shape: f32[8,32], index: 12, kind: output, shape index: {1}]  }
   0x1   :  { %19 = vsyncpa [#allocation4], 0  ;;  %s1745_s21 = smov [#allocation2]   ;;  %s1697_s25 = scalar_lea.hbm %s2059_s0, 256 }
   0x2   :  { %s25_s22 = sshll.u32 %s1745_s21, 4  ;;  %p1698_p0 = scmp.ne.s32.totalorder %s2059_s0, %s1697_s25  ;;  %s26_s22 = int_to_ptr.vmem [resolvable:$true] %s25_s22 }
   0x3   :  { %p1701_p1 = scmp.lt.u32.totalorder %s1697_s25, %s2059_s0 }
   0x5   :  { %p1703_p2 = pnand %p1701_p1, %p1698_p0 }
   0x7   :  { %1706 = shalt.err (!%p1703_p2)
}
   0x8   :  { %s1707_s30 = scalar_lea.vmem %s26_s22, 256  ;;  %p1712_p4 = scmp.lt.s32.totalorder %s26_s22, %s26_s22 }
   0x9   :  { %p1708_p3 = scmp.ne.s32.totalorder %s26_s22, %s1707_s30  ;;  %p1713_p5 = scmp.lt.s32.totalorder %s1707_s30, %s1707_s30 }
   0xb   :  { %p1714_p6 = por %p1713_p5, %p1712_p4 }
   0xd   :  { %p1715_p7 = pnand %p1714_p6, %p1708_p3 }
   0xf   :  { %1718 = shalt.err (!%p1715_p7)
}
  0x10   :  { %s1746_s13 = smov 128   ;;  %s1747_s14 = smov 8  }
  0x11   :  { %31 = dma.hbm_to_vmem [thread:$0]  %s2059_s0, 256, %s26_s22, [#allocation3], %s1746_s13, %s1746_s13, %s1747_s14  }
  0x12   :  { %1741 = dma.done.wait [#allocation3], 256  }
  0x13   :  { %1742 = vsyncadd [#allocation3], 4294967040  ;;  %vm61_vm0 = vcmask 261120   ;;  %v57_v0 = vld [vmem:[%s2060_s1] sm:$0xff]  ;;  %v58_v1 = vld [vmem:[%s2060_s1 + $0x8] sm:$0xff]  ;;  %v1748_v8 = vmov 0.0  }
  0x14   :  { %v59_v2 = vld [vmem:[%s2060_s1 + $0x10] sm:$0xff]  ;;  %v1609_v3 = vpack.c.bf16 %v58_v1, %v57_v0  ;;  %v60_v4 = vld [vmem:[%s2060_s1 + $0x18] sm:$0xff]  ;;  %v1851_v5 = vld [vmem:[#allocation2] sm:$0xff]  ;;  %vm1749_vm1 = vmmov 0   ;;  %s1750_s0 = smov 96   ;;  %s1751_s1 = smov 112  }
  0x15   :  { %v1613_v6 = vpack.c.bf16 %v60_v4, %v59_v2  ;;  %1508 = vmatprep.mubr.msk.f32.mxu1 %vm61_vm0, %v1851_v5  ;;  %v1855_v7 = vld [vmem:[#allocation2 + $0x8] sm:$0xff]  ;;  %1525 = vmatprep.mubr.msk.f32.mxu0 %vm1749_vm1, %v1748_v8  ;;  %s1752_s22 = smov 64   ;;  %s1753_s26 = smov 80   ;;  %vm146_vm2 = vcmask 130048   ;;  %vm221_vm3 = vcmask 64512   ;;  %v309_v21 = vld [vmem:[%s2061_s2] sm:$0xff] }
  0x16   :  { %1610 = vmatprep.subr.bf16.mxu1 %v1609_v3  ;;  %v310_v22 = vld [vmem:[%s2061_s2 + $0x8] sm:$0xff]  ;;  %v1754_v23 = vmov 0.0|0.0   ;;  %s1755_s15 = smov 48   ;;  %v550_v0 = vld [vmem:[%s2061_s2 + $0x10] sm:$0xff]  ;;  %v551_v1 = vld [vmem:[%s2061_s2 + $0x18] sm:$0xff]  ;;  %s1756_s2 = smov 16  }
  0x17   :  { %1612 = vmatpush3.bf16.msra.mxu1 %v1609_v3  ;;  %1617 = vmatprep.subr.bf16.mxu0 %v1754_v23  ;;  %v1892_v24 = vpack.c.bf16 %v310_v22, %v309_v21  ;;  %v1621_v2 = vpack.c.bf16 %v551_v1, %v550_v0  ;;  %vm1271_vm4 = vcmask 523264   ;;  %vm1114_vm5 = vcmask 195584   ;;  %s1758_s30 = smov [#allocation5]  }
  0x18   :  { %1614 = vmatprep.subr.bf16.mxu1 %v1613_v6 }
  0x19   :  { %1619 = vmatpush3.bf16.msra.mxu0 %v1892_v24 }
  0x1a   :  { %1533 = vmatprep.subr.mxu0 %v1748_v8 }
  0x1b   :  { %1616 = vmatpush3.bf16.msra.mxu1 %v1613_v6 }
  0x1c   :  { %1511 = vmatprep.subr.mxu1 %v1748_v8 }
  0x1e   :  { %1509 = vmatmul.mubr.msk.f32.vlgmr.msra.gmra.mrb[0].mxu1 %vm61_vm0, %v1855_v7 }
  0x1f   :  { %1513 = vmatprep.mubr.msk.f32.mxu1 %vm1749_vm1, %v1748_v8 }
  0xf1   :  { %v1864_v9 = vpop.f32.mrb[0].mxu1 }
  0xf2   :  { %v1866_v10 = vpop.f32.mrb[1].mxu1 }
  0xf3   :  { %233 = vrot.lane.b32.xlu1 %v1866_v10, %s1750_s0  ;;  %144 = vrot.lane.b32.xlu0 %v1866_v10, %s1751_s1 }
  0xf7   :  { %387 = vrot.lane.b32.xlu1 %v1866_v10, %s1752_s22 }
  0xfb   :  { %385 = vrot.lane.b32.xlu1 %v1866_v10, %s1753_s26 }
 0x165   :  { %v145_v11 = vpop.permute.xlu0 %144  ;;  %v234_v12 = vpop.permute.xlu1 %233 }
 0x166   :  { %1512 = vmatpush3.xpose.msk.msra.mxu1 %vm146_vm2, %v145_v11 }
 0x167   :  { %1516 = vmatprep.subr.mxu1 %v1748_v8 }
 0x169   :  { %1514 = vmatmul.mubr.msk.f32.vlgmr.msra.gmra.mrb[2].mxu1 %vm146_vm2, %v1866_v10  ;;  %v388_v25 = vpop.permute.xlu1 %387 }
 0x16a   :  { %1517 = vmatpush3.msra.mxu1 %v234_v12  ;;  %1518 = vmatprep.mubr.msk.f32.mxu1 %vm1749_vm1, %v1748_v8 }
 0x16b   :  { %1528 = vmatprep.subr.mxu1 %v1748_v8 }
 0x16d   :  { %v386_v26 = vpop.permute.xlu1 %385 }
 0x23c   :  { %v217_v13 = vpop.f32.mrb[2].mxu1 }
 0x23d   :  { %v1515_v14 = vpop.f32.mrb[3].mxu1  ;;  %v222_v15 = vsel %vm221_vm3, %v217_v13, -inf }
 0x23e   :  { %223 = vmax.xlane.f32.xlu0 %v222_v15 }
 0x254   :  { %714 = vrot.lane.b32.xlu0 %v1864_v9, %s1750_s0 }
 0x258   :  { %866 = vrot.lane.b32.xlu0 %v1864_v9, %s1752_s22 }
 0x2cb   :  { %v224_v16 = vpop.xlane.xlu0 %223 }
 0x2cc   :  { %v225_v17 = vsub.f32 %v217_v13, %v224_v16 }
 0x2ce   :  { %v226_v18 = vmul.f32 1.442695, %v225_v17 }
 0x2cf   :  { %v715_v31 = vpop.permute.xlu0 %714 }
 0x2d0   :  { %1673 = vpow2.f32 %v226_v18 }
 0x2d3   :  { %v867_v45 = vpop.permute.xlu0 %866 }
 0x2da   :  { %v1674_v19 = vpop.eup %1673 }
 0x2db   :  { %v228_v20 = vsel %vm221_vm3, %v1674_v19, 0.0 }
 0x2dc   :  { %229 = vadd.xlane.f32.xlu1 %v228_v20 }
 0x2ed   :  { %627 = vrot.lane.b32.xlu1 %v1864_v9, %s1751_s1 }
 0x369   :  { %v230_v27 = vpop.xlane.xlu1 %229 }
 0x36a   :  { %1675 = vrcp.f32 %v230_v27 }
 0x36d   :  { %v628_v30 = vpop.permute.xlu1 %627 }
 0x374   :  { %v1676_v28 = vpop.eup %1675 }
 0x375   :  { %v1896_v29 = vmul.f32 %v1676_v28, %v1674_v19 }
 0x377   :  { %1519 = vmatmul.mubr.msk.f32.vlgmr.msra.gmra.mrb[4].mxu1 %vm221_vm3, %v1896_v29 }
 0x378   :  { %1529 = vmatpush3.xpose.msk.msra.mxu1 %vm146_vm2, %v388_v25  ;;  %1530 = vmatprep.mubr.msk.f32.mxu1 %vm1749_vm1, %v1748_v8 }
 0x379   :  { %1545 = vmatprep.subr.mxu1 %v1748_v8 }
 0x37b   :  { %1531 = vmatmul.mubr.msk.f32.vlgmr.msra.gmra.mrb[6].mxu1 %vm146_vm2, %v386_v26 }
 0x37c   :  { %1546 = vmatpush3.xpose.msk.msra.mxu1 %vm146_vm2, %v628_v30  ;;  %1547 = vmatprep.mubr.msk.f32.mxu1 %vm1749_vm1, %v1748_v8 }
 0x37d   :  { %1550 = vmatprep.subr.mxu1 %v1748_v8 }
 0x37f   :  { %1548 = vmatmul.mubr.msk.f32.vlgmr.msra.gmra.mrb[8].mxu1 %vm146_vm2, %v1864_v9 }
 0x380   :  { %1551 = vmatpush3.msra.mxu1 %v715_v31  ;;  %1552 = vmatprep.mubr.msk.f32.mxu1 %vm1749_vm1, %v1748_v8 }
 0x381   :  { %1562 = vmatprep.subr.mxu1 %v1748_v8 }
 0x44a   :  { %v305_v32 = vpop.f32.mrb[4].mxu1 }
 0x44b   :  { %v1520_v33 = vpop.f32.mrb[5].mxu1  ;;  %1526 = vmatmul.mubr.msk.f32.vlgmr.msra.gmra.mrb[0].mxu0 %vm146_vm2, %v305_v32 }
 0x44c   :  { %1535 = vmatprep.mubr.msk.f32.mxu0 %vm1749_vm1, %v1748_v8 }
 0x44e   :  { %v459_v34 = vpop.f32.mrb[6].mxu1 }
 0x44f   :  { %v1532_v35 = vpop.f32.mrb[7].mxu1  ;;  %v463_v44 = vsel %vm221_vm3, %v459_v34, -inf }
 0x452   :  { %v699_v36 = vpop.f32.mrb[8].mxu1 }
 0x453   :  { %v1549_v37 = vpop.f32.mrb[9].mxu1  ;;  %v703_v38 = vsel %vm221_vm3, %v699_v36, -inf }
 0x454   :  { %704 = vmax.xlane.f32.xlu1 %v703_v38 }
 0x4e1   :  { %v705_v39 = vpop.xlane.xlu1 %704 }
 0x4e2   :  { %v706_v40 = vsub.f32 %v699_v36, %v705_v39  ;;  %v1440_v39 = vld [vmem:[%s2066_s7] ss:$0 sm:$0xff] }
 0x4e4   :  { %v707_v41 = vmul.f32 1.442695, %v706_v40 }
 0x4e6   :  { %1677 = vpow2.f32 %v707_v41  ;;  %v1441_v41 = vld [vmem:[%s2067_s8] ss:$0 sm:$0xff] }
 0x4f0   :  { %v1678_v42 = vpop.eup %1677 }
 0x4f1   :  { %v709_v43 = vsel %vm221_vm3, %v1678_v42, 0.0 }
 0x4f2   :  { %710 = vadd.xlane.f32.xlu0 %v709_v43 }
 0x508   :  { %864 = vrot.lane.b32.xlu0 %v1864_v9, %s1753_s26 }
 0x527   :  { %464 = vmax.xlane.f32.xlu0 %v463_v44  ;;  %v1162_v44 = vld [vmem:[%s2062_s3] sm:$0xff] }
 0x57f   :  { %v711_v46 = vpop.xlane.xlu0 %710 }
 0x580   :  { %1679 = vrcp.f32 %v711_v46 }
 0x583   :  { %v865_v49 = vpop.permute.xlu0 %864 }
 0x58a   :  { %v1680_v47 = vpop.eup %1679 }
 0x58b   :  { %v1922_v48 = vmul.f32 %v1680_v47, %v1678_v42  ;;  %v1164_v47 = vld [vmem:[%s2062_s3 + $0x10] sm:$0xff] }
 0x58d   :  { %1553 = vmatmul.mubr.msk.f32.vlgmr.msra.gmra.mrb[10].mxu1 %vm221_vm3, %v1922_v48 }
 0x58e   :  { %1563 = vmatpush3.xpose.msk.msra.mxu1 %vm146_vm2, %v867_v45  ;;  %1564 = vmatprep.mubr.msk.f32.mxu1 %vm1749_vm1, %v1748_v8  ;;  %v1163_v45 = vld [vmem:[%s2062_s3 + $0x8] sm:$0xff] }
 0x58f   :  { %v1629_v46 = vpack.c.bf16 %v1163_v45, %v1162_v44 }
 0x591   :  { %1565 = vmatmul.mubr.msk.f32.vlgmr.msra.gmra.mrb[12].mxu1 %vm146_vm2, %v865_v49  ;;  %1630 = vmatprep.subr.bf16.mxu1 %v1629_v46 }
 0x592   :  { %1632 = vmatpush3.bf16.msra.mxu1 %v1629_v46  ;;  %v1449_v46 = vld [vmem:[%s2069_s10] ss:$0 sm:$0xff] }
 0x5b4   :  { %v465_v50 = vpop.xlane.xlu0 %464 }
 0x5b5   :  { %v466_v51 = vsub.f32 %v459_v34, %v465_v50  ;;  %v1256_v50 = vld [vmem:[%s2064_s5] sm:$0xff] }
 0x5b7   :  { %v467_v52 = vmul.f32 1.442695, %v466_v51  ;;  %v1257_v51 = vld [vmem:[%s2064_s5 + $0x8] sm:$0xff] }
 0x5b9   :  { %1681 = vpow2.f32 %v467_v52  ;;  %v1258_v52 = vld [vmem:[%s2064_s5 + $0x10] sm:$0xff] }
 0x5c3   :  { %v1682_v53 = vpop.eup %1681 }
 0x5c4   :  { %v469_v54 = vsel %vm221_vm3, %v1682_v53, 0.0 }
 0x5c5   :  { %470 = vadd.xlane.f32.xlu1 %v469_v54  ;;  %v1259_v54 = vld [vmem:[%s2064_s5 + $0x18] sm:$0xff] }
 0x5d6   :  { %474 = vrot.lane.b32.xlu1 %v1866_v10, %s1755_s15 }
 0x652   :  { %v471_v55 = vpop.xlane.xlu1 %470 }
 0x653   :  { %1683 = vrcp.f32 %v471_v55  ;;  %v1641_v55 = vpack.c.bf16 %v1259_v54, %v1258_v52 }
 0x656   :  { %v475_v56 = vpop.permute.xlu1 %474 }
 0x657   :  { %1534 = vmatpush3.msra.mxu0 %v475_v56  ;;  %v1260_v56 = vld [vmem:[%s2064_s5 + $0x20] sm:$0xff] }
 0x658   :  { %1620 = vmatprep.subr.bf16.mxu0 %v1754_v23 }
 0x65d   :  { %v1684_v57 = vpop.eup %1683 }
 0x65e   :  { %v1933_v58 = vmul.f32 %v1684_v57, %v1682_v53  ;;  %v1637_v53 = vpack.c.bf16 %v1257_v51, %v1256_v50  ;;  %v1261_v57 = vld [vmem:[%s2064_s5 + $0x28] sm:$0xff] }
 0x660   :  { %1536 = vmatmul.mubr.msk.f32.vlgmr.msra.gmra.mrb[2].mxu0 %vm221_vm3, %v1933_v58  ;;  %v786_v59 = vpop.f32.mrb[10].mxu1 }
 0x661   :  { %v1554_v60 = vpop.f32.mrb[11].mxu1  ;;  %1542 = vmatprep.mubr.msk.f32.mxu0 %vm1749_vm1, %v1748_v8  ;;  %1622 = vmatpush3.bf16.msra.mxu0 %v1621_v2 }
 0x662   :  { %1623 = vmatprep.subr.bf16.mxu0 %v1754_v23 }
 0x664   :  { %v938_v61 = vpop.f32.mrb[12].mxu1 }
 0x665   :  { %v1566_v62 = vpop.f32.mrb[13].mxu1  ;;  %v942_v63 = vsel %vm221_vm3, %v938_v61, -inf }
 0x666   :  { %943 = vmax.xlane.f32.xlu1 %v942_v63 }
 0x6f3   :  { %v944_v3 = vpop.xlane.xlu1 %943 }
 0x6f4   :  { %v945_v4 = vsub.f32 %v938_v61, %v944_v3  ;;  %v1262_v3 = vld [vmem:[%s2064_s5 + $0x30] sm:$0xff] }
 0x6f6   :  { %v946_v6 = vmul.f32 1.442695, %v945_v4  ;;  %v1263_v4 = vld [vmem:[%s2064_s5 + $0x38] sm:$0xff] }
 0x6f8   :  { %1685 = vpow2.f32 %v946_v6  ;;  %v1649_v6 = vpack.c.bf16 %v1263_v4, %v1262_v3 }
 0x702   :  { %v1686_v10 = vpop.eup %1685 }
 0x703   :  { %v948_v11 = vsel %vm221_vm3, %v1686_v10, 0.0 }
 0x704   :  { %949 = vadd.xlane.f32.xlu0 %v948_v11 }
 0x71a   :  { %953 = vrot.lane.b32.xlu0 %v1864_v9, %s1755_s15  ;;  %s1406_s15 = sshll.u32 %s1758_s30, 4  ;;  %s1407_s15 = int_to_ptr.vmem [resolvable:$true] %s1406_s15 }
 0x71b   :  { %p1724_p9 = scmp.lt.s32.totalorder %s1407_s15, %s1407_s15 }
 0x733   :  { %v546_v12 = vpop.f32.mrb[2].mxu0 }
 0x734   :  { %v1537_v13 = vpop.f32.mrb[3].mxu0  ;;  %1543 = vmatmul.mubr.msk.f32.vlgmr.msra.gmra.mrb[0].mxu0 %vm146_vm2, %v546_v12 }
 0x735   :  { %1625 = vmatpush3.bf16.msra.mxu0 %v1892_v24  ;;  %1559 = vmatprep.mubr.msk.f32.mxu0 %vm1749_vm1, %v1748_v8 }
 0x736   :  { %1567 = vmatprep.subr.mxu0 %v1748_v8 }
 0x738   :  { %1560 = vmatmul.mubr.msk.f32.vlgmr.msra.gmra.mrb[4].mxu0 %vm146_vm2, %v786_v59  ;;  %v1645_v59 = vpack.c.bf16 %v1261_v57, %v1260_v56 }
 0x739   :  { %1569 = vmatprep.mubr.msk.f32.mxu0 %vm1749_vm1, %v1748_v8 }
 0x791   :  { %v950_v14 = vpop.xlane.xlu0 %949 }
 0x792   :  { %1687 = vrcp.f32 %v950_v14 }
 0x795   :  { %v954_v15 = vpop.permute.xlu0 %953 }
 0x796   :  { %1568 = vmatpush3.msra.mxu0 %v954_v15 }
 0x797   :  { %1626 = vmatprep.subr.bf16.mxu0 %v1754_v23 }
 0x79c   :  { %v1688_v9 = vpop.eup %1687 }
 0x79d   :  { %v1958_v16 = vmul.f32 %v1688_v9, %v1686_v10  ;;  %v1442_v10 = vld [vmem:[%s2063_s4] ss:$0 sm:$0xff]  ;;  %s1757_s4 = smov 24  }
 0x79f   :  { %1570 = vmatmul.mubr.msk.f32.vlgmr.msra.gmra.mrb[6].mxu0 %vm221_vm3, %v1958_v16 }
 0x7a0   :  { %1628 = vmatpush3.bf16.msra.mxu0 %v1621_v2  ;;  %1576 = vmatprep.mubr.msk.f32.mxu0 %vm1749_vm1, %v1748_v8 }
 0x7a1   :  { %1638 = vmatprep.subr.bf16.mxu0 %v1637_v53 }
 0x807   :  { %v621_v17 = vpop.f32.mrb[0].mxu0 }
 0x808   :  { %v1653_v18 = vadd.f32 %v621_v17, %v1851_v5  ;;  %v1544_v19 = vpop.f32.mrb[1].mxu0  ;;  %v1445_v17 = vld [vmem:[%s2065_s6] ss:$0 sm:$0xff] }
 0x80a   :  { %v1117_v20 = vsel %vm61_vm0, %v1653_v18, 0.0 }
 0x80b   :  { %1118 = vadd.xlane.f32.xlu0 %v1117_v20 }
 0x821   :  { %1106 = vrot.lane.b32.xlu0 %v1922_v48, %s1756_s2  ;;  %v1165_v48 = vld [vmem:[%s2062_s3 + $0x18] sm:$0xff] }
 0x822   :  { %v1633_v49 = vpack.c.bf16 %v1165_v48, %v1164_v47 }
 0x824   :  { %1634 = vmatprep.subr.bf16.mxu1 %v1633_v49 }
 0x825   :  { %1636 = vmatpush3.bf16.msra.mxu1 %v1633_v49 }
 0x872   :  { %v1025_v21 = vpop.f32.mrb[6].mxu0 }
 0x873   :  { %v1571_v22 = vpop.f32.mrb[7].mxu0  ;;  %1577 = vmatmul.mubr.msk.f32.vlgmr.msra.gmra.mrb[4].mxu0 %vm146_vm2, %v1025_v21 }
 0x874   :  { %1640 = vmatpush3.bf16.msra.mxu0 %v1637_v53 }
 0x875   :  { %1642 = vmatprep.subr.bf16.mxu0 %v1641_v55 }
 0x878   :  { %1644 = vmatpush3.bf16.msra.mxu0 %v1641_v55 }
 0x879   :  { %1646 = vmatprep.subr.bf16.mxu0 %v1645_v59 }
 0x87c   :  { %1648 = vmatpush3.bf16.msra.mxu0 %v1645_v59 }
 0x87d   :  { %1650 = vmatprep.subr.bf16.mxu0 %v1649_v6 }
 0x880   :  { %1652 = vmatpush3.bf16.msra.mxu0 %v1649_v6 }
 0x898   :  { %v1119_v23 = vpop.xlane.xlu0 %1118 }
 0x899   :  { %v1124_v24 = vmul.f32 0.03125, %v1119_v23 }
 0x89b   :  { %v1126_v25 = vsub.f32 %v1653_v18, %v1124_v24 }
 0x89d   :  { %v1128_v28 = vmul.f32 %v1126_v25, %v1126_v25 }
 0x89f   :  { %v1130_v30 = vsel %vm61_vm0, %v1128_v28, 0.0 }
 0x946   :  { %v1098_v26 = vpop.f32.mrb[4].mxu0 }
 0x947   :  { %v1654_v8 = vadd.f32 %v1098_v26, %v1855_v7  ;;  %v1578_v27 = vpop.f32.mrb[5].mxu0 }
 0x949   :  { %v1120_v5 = vsel %vm61_vm0, %v1654_v8, 0.0 }
 0x94a   :  { %1121 = vadd.xlane.f32.xlu1 %v1120_v5 }
 0x94e   :  { %1131 = vadd.xlane.f32.xlu1 %v1130_v30 }
 0x9d7   :  { %v1122_v31 = vpop.xlane.xlu1 %1121 }
 0x9d8   :  { %v1125_v32 = vmul.f32 0.03125, %v1122_v31 }
 0x9da   :  { %v1127_v33 = vsub.f32 %v1654_v8, %v1125_v32 }
 0x9db   :  { %v1132_v34 = vpop.xlane.xlu1 %1131 }
 0x9dc   :  { %v1136_v35 = vmul.f32 0.03125, %v1132_v34  ;;  %v1129_v36 = vmul.f32 %v1127_v33, %v1127_v33 }
 0x9de   :  { %v1138_v37 = vadd.f32 1e-06, %v1136_v35  ;;  %v1133_v38 = vsel %vm61_vm0, %v1129_v36, 0.0 }
 0x9df   :  { %1134 = vadd.xlane.f32.xlu1 %v1133_v38 }
 0x9e0   :  { %1689 = vrsqrt.f32 %v1138_v37 }
 0x9ea   :  { %v1690_v7 = vpop.eup %1689 }
 0x9eb   :  { %v1142_v40 = vmul.f32 %v1690_v7, %v1126_v25 }
 0x9ed   :  { %v1151_v42 = vmul.f32 %v1440_v39, %v1142_v40  ;;  %v1107_v40 = vpop.permute.xlu0 %1106 }
 0x9ef   :  { %v1160_v43 = vadd.f32 %v1441_v41, %v1151_v42 }
 0x9f1   :  { %1587 = vmatprep.mubr.msk.f32.mxu1 %vm61_vm0, %v1160_v43 }
 0xa6c   :  { %v1135_v60 = vpop.xlane.xlu1 %1134 }
 0xa6d   :  { %v1137_v61 = vmul.f32 0.03125, %v1135_v60 }
 0xa6f   :  { %v1139_v62 = vadd.f32 1e-06, %v1137_v61 }
 0xa71   :  { %1691 = vrsqrt.f32 %v1139_v62 }
 0xa7b   :  { %v1692_v63 = vpop.eup %1691 }
 0xa7c   :  { %v1143_v0 = vmul.f32 %v1692_v63, %v1127_v33 }
 0xa7e   :  { %v1152_v1 = vmul.f32 %v1440_v39, %v1143_v0 }
 0xa80   :  { %v1161_v2 = vadd.f32 %v1441_v41, %v1152_v1 }
 0xa82   :  { %1588 = vmatmul.mubr.msk.f32.vlgmr.msra.gmra.mrb[14].mxu1 %vm61_vm0, %v1161_v2 }
 0xb55   :  { %v1589_v11 = vpop.f32.mrb[14].mxu1 }
 0xb56   :  { %v1251_v12 = vadd.f32 %v1589_v11, %v1442_v10  ;;  %v1245_v13 = vpop.f32.mrb[15].mxu1 }
 0xb57   :  { %v1246_v14 = vadd.f32 %v1442_v10, %v1245_v13 }
 0xb58   :  { %v1255_v9 = vmax.f32 %v1251_v12, 0.0 }
 0xb59   :  { %v1254_v15 = vmax.f32 %v1246_v14, 0.0 }
 0xb5b   :  { %1606 = vmatprep.mubr.msk.f32.mxu0 %vm1271_vm4, %v1254_v15 }
 0xb5c   :  { %1607 = vmatmul.mubr.msk.f32.vlgmr.msra.gmra.mrb[8].mxu0 %vm1271_vm4, %v1255_v9 }
 0xc2f   :  { %v1608_v18 = vpop.f32.mrb[8].mxu0 }
 0xc30   :  { %v1344_v19 = vpop.f32.mrb[9].mxu0  ;;  %v1350_v20 = vadd.f32 %v1608_v18, %v1445_v17 }
 0xc31   :  { %v1345_v21 = vadd.f32 %v1445_v17, %v1344_v19 }
 0xc32   :  { %v1354_v24 = vadd.f32 %v1350_v20, %v1161_v2 }
 0xc33   :  { %v1353_v22 = vadd.f32 %v1345_v21, %v1160_v43 }
 0xc34   :  { %v1358_v25 = vsel %vm61_vm0, %v1354_v24, 0.0 }
 0xc35   :  { %v1355_v23 = vsel %vm61_vm0, %v1353_v22, 0.0 }
 0xc36   :  { %1356 = vadd.xlane.f32.xlu1 %v1355_v23 }
 0xc3a   :  { %1359 = vadd.xlane.f32.xlu1 %v1358_v25 }
 0xc4b   :  { %1103 = vrot.lane.b32.xlu1 %v1933_v58, %s1747_s14 }
 0xcc3   :  { %v1357_v26 = vpop.xlane.xlu1 %1356 }
 0xcc4   :  { %v1361_v8 = vmul.f32 0.03125, %v1357_v26 }
 0xcc6   :  { %v1363_v28 = vsub.f32 %v1353_v22, %v1361_v8 }
 0xcc7   :  { %v1360_v27 = vpop.xlane.xlu1 %1359 }
 0xcc8   :  { %v1362_v5 = vmul.f32 0.03125, %v1360_v27  ;;  %v1365_v33 = vmul.f32 %v1363_v28, %v1363_v28 }
 0xcca   :  { %v1364_v30 = vsub.f32 %v1354_v24, %v1362_v5  ;;  %v1367_v34 = vsel %vm61_vm0, %v1365_v33, 0.0 }
 0xccb   :  { %v1104_v35 = vpop.permute.xlu1 %1103 }
 0xccc   :  { %v1366_v31 = vmul.f32 %v1364_v30, %v1364_v30  ;;  %v1112_v7 = vsel %vm221_vm3, %v1896_v29, %v1104_v35  ;;  %v1448_v29 = vld [vmem:[%s2068_s9] ss:$0 sm:$0xff] }
 0xccd   :  { %v1113_v42 = vsel %vm146_vm2, %v1112_v7, %v1107_v40 }
 0xcce   :  { %v1370_v32 = vsel %vm61_vm0, %v1366_v31, 0.0 }
 0xccf   :  { %1371 = vadd.xlane.f32.xlu1 %v1370_v32 }
 0xcd3   :  { %1368 = vadd.xlane.f32.xlu1 %v1367_v34 }
 0xce4   :  { %1109 = vrot.lane.b32.xlu1 %v1958_v16, %s1757_s4 }
 0xd5c   :  { %v1372_v36 = vpop.xlane.xlu1 %1371 }
 0xd5d   :  { %v1374_v58 = vmul.f32 0.03125, %v1372_v36 }
 0xd5f   :  { %v1376_v37 = vadd.f32 1e-06, %v1374_v58 }
 0xd60   :  { %v1369_v38 = vpop.xlane.xlu1 %1368 }
 0xd61   :  { %1693 = vrsqrt.f32 %v1376_v37  ;;  %v1373_v39 = vmul.f32 0.03125, %v1369_v38 }
 0xd63   :  { %v1375_v41 = vadd.f32 1e-06, %v1373_v39 }
 0xd64   :  { %v1110_v43 = vpop.permute.xlu1 %1109 }
 0xd65   :  { %1695 = vrsqrt.f32 %v1375_v41  ;;  %v1115_v44 = vsel %vm1114_vm5, %v1113_v42, %v1110_v43 }
 0xd66   :  { %1116 = vst.msk [vmem:[%s2071_s12] sm:$0xff] %vm61_vm0, %v1115_v44  ;;  %s1719_s12 = scalar_lea.vmem %s1407_s15, 256 }
 0xd67   :  { %p1720_p8 = scmp.ne.s32.totalorder %s1407_s15, %s1719_s12  ;;  %p1725_p10 = scmp.lt.s32.totalorder %s1719_s12, %s1719_s12 }
 0xd69   :  { %p1726_p11 = por %p1725_p10, %p1724_p9 }
 0xd6b   :  { %v1694_v16 = vpop.eup %1693  ;;  %p1727_p12 = pnand %p1726_p11, %p1720_p8 }
 0xd6c   :  { %v1380_v45 = vmul.f32 %v1694_v16, %v1364_v30 }
 0xd6e   :  { %v1389_v47 = vmul.f32 %v1448_v29, %v1380_v45 }
 0xd6f   :  { %v1696_v48 = vpop.eup %1695 }
 0xd70   :  { %v1379_v49 = vmul.f32 %v1696_v48, %v1363_v28  ;;  %v1398_v50 = vadd.f32 %v1449_v46, %v1389_v47 }
 0xd72   :  { %v1388_v51 = vmul.f32 %v1448_v29, %v1379_v49  ;;  %1400 = vst.msk [vmem:[#allocation5 + $0x8] sm:$0xff] %vm61_vm0, %v1398_v50 }
 0xd74   :  { %v1397_v52 = vadd.f32 %v1449_v46, %v1388_v51 }
 0xd76   :  { %1399 = vst.msk [vmem:[#allocation5] sm:$0xff] %vm61_vm0, %v1397_v52 }
 0xd77   :  { %1730 = shalt.err (!%p1727_p12)
}
 0xd78   :  { %s1731_s16 = scalar_lea.hbm %s2070_s11, 256 }
 0xd79   :  { %p1732_p13 = scmp.ne.s32.totalorder %s2070_s11, %s1731_s16  ;;  %p1735_p0 = scmp.lt.u32.totalorder %s1731_s16, %s2070_s11 }
 0xd7b   :  { %p1737_p1 = pnand %p1735_p0, %p1732_p13 }
 0xd7d   :  { %1740 = shalt.err (!%p1737_p1)
}
 0xd7e   :  { %1412 = dma.vmem_to_hbm [thread:$0]  %s1407_s15, 256, %s2070_s11, [#allocation4], %s1746_s13, %s1746_s13, %s1747_s14  }
 0xd7f   :  { %1743 = dma.done.wait [#allocation4], 256  }
 0xd80   :  { %1744 = vsyncadd [#allocation4], 4294967040 }
 0xd81   :  { %1420 = vsyncpa [#allocation3], 1 }
 0xd82   :  { %1421 = vsyncpa [#allocation4], 1 }

</bundles_post_ra>
